<compile_context>
chip_gen: v5e
topology: v5e:2x2
jax: 0.10.0
libtpu: 0.0.40
codegen_flags: <defaults>
</compile_context>

<pallas_src>
import jax
import jax.numpy as jnp
from jax.experimental import pallas as pl
from jax.experimental.pallas import tpu as pltpu


def _normalize_kernel(mean_ref, inv_std_ref, x_ref, o_ref):
    # mean_ref / inv_std_ref: (TR, 1) float32 blocks, broadcast across lanes.
    # x_ref: (TR, TL) block of the flattened (N*C, H*W) image (any dtype).
    # o_ref: (TR, TL) float32 output block.
    x = x_ref[...].astype(jnp.float32)
    o_ref[...] = ((x - mean_ref[...]) * inv_std_ref[...]).astype(o_ref.dtype)


def _sublane_align(itemsize: int) -> int:
    # f32 -> 8 rows per vreg, bf16 -> 16, int8/uint8 -> 32 (sublane packing).
    return 8 * max(1, 4 // itemsize)


def _choose_tiles(R, L, in_itemsize, out_itemsize, target_bytes):
    """Pick (TR, TL): lane-dense blocks whose largest-dtype footprint stays
    within target_bytes, rows aligned to the dtype packing factor."""
    itemsize = max(in_itemsize, out_itemsize)  # budget the bigger (f32) block
    row_align = max(_sublane_align(in_itemsize), _sublane_align(out_itemsize))

    # Lane tile: multiple of 128, capped so even a row_align-high block fits
    # the budget (trailing partial lane block is masked by Pallas).
    max_tl = max(128, ((target_bytes // (row_align * itemsize)) // 128) * 128)
    TL = L if L <= max_tl else max_tl

    # Row tile from the remaining budget, rounded to the packing alignment.
    TR = max(1, target_bytes // (TL * itemsize))
    if TR >= R:
        TR = R
    else:
        TR = min(R, max(row_align, (TR // row_align) * row_align))

    # Guarantee >=2 grid steps along a parallel axis when the whole image fits
    # in one block, so both v7x TensorCores (sharing 3.2 TB/s HBM) get work.
    if pl.cdiv(R, TR) * pl.cdiv(L, TL) < 2:
        if R >= 2 * row_align:
            TR = min(R, ((pl.cdiv(R, 2) + row_align - 1) // row_align) * row_align)
        elif L >= 256:
            TL = ((pl.cdiv(L, 2) + 127) // 128) * 128
    return TR, TL


def normalize_image(image: jax.Array, mean: jax.Array, std: jax.Array,
                    *, target_block_bytes: int = 4 * 1024 * 1024) -> jax.Array:
    """image: (N, C, H, W) any int/float dtype; mean/std: (C,) float.
    Returns float32 normalized image (matches PyTorch float promotion)."""
    N, C, H, W = image.shape
    out_dtype = jnp.float32

    R, L = N * C, H * W
    x2d = image.reshape(R, L)  # contiguous NCHW -> free reshape

    # Per-row (n, c) scalars in float32: row r -> channel r % C.
    mean_r = jnp.tile(mean.astype(jnp.float32), N).reshape(R, 1)
    inv_std_r = jnp.tile(1.0 / std.astype(jnp.float32), N).reshape(R, 1)

    in_isz = jnp.dtype(image.dtype).itemsize
    out_isz = jnp.dtype(out_dtype).itemsize
    TR, TL = _choose_tiles(R, L, in_isz, out_isz, target_block_bytes)
    grid = (pl.cdiv(R, TR), pl.cdiv(L, TL))

    out2d = pl.pallas_call(
        _normalize_kernel,
        out_shape=jax.ShapeDtypeStruct((R, L), out_dtype),
        grid_spec=pltpu.PrefetchScalarGridSpec(
            num_scalar_prefetch=0,
            grid=grid,
            in_specs=[
                pl.BlockSpec((TR, 1), lambda i, j: (i, 0)),   # mean rows (f32)
                pl.BlockSpec((TR, 1), lambda i, j: (i, 0)),   # 1/std rows (f32)
                pl.BlockSpec((TR, TL), lambda i, j: (i, j)),  # raw image rows
            ],
            out_specs=pl.BlockSpec((TR, TL), lambda i, j: (i, j)),
        ),
        compiler_params=pltpu.CompilerParams(
            dimension_semantics=("parallel", "parallel"),
            vmem_limit_bytes=48 * 1024 * 1024,  # headroom on all of v5e/v6e/v7x
        ),
        cost_estimate=pl.CostEstimate(
            flops=2 * R * L,
            transcendentals=0,
            bytes_accessed=R * L * (in_isz + out_isz) + 2 * R * 4,
        ),
    )(mean_r, inv_std_r, x2d)

    return out2d.reshape(N, C, H, W)


class Normalize:
    """JAX/Pallas equivalent of the PyTorch Normalize module."""

    def __init__(self, mean, std):
        self.mean = jnp.asarray(mean, dtype=jnp.float32)  # (C,)
        self.std = jnp.asarray(std, dtype=jnp.float32)    # (C,)

    def __call__(self, batch: dict) -> dict:
        # TODO(synk): PyTorch mutates batch['image'] in place; we return a new dict.
        out = dict(batch)
        out["image"] = normalize_image(batch["image"], self.mean, self.std)
        return out


if __name__ == "__main__":
    # Small deterministic example: N=2, C=4, H=W=16 (NCHW, like PyTorch).
    key = jax.random.PRNGKey(0)
    kf, ki = jax.random.split(key)

    mean = [0.1, 0.2, 0.3, 0.4]
    std = [0.5, 0.6, 0.7, 0.8]
    mean_b = jnp.asarray(mean, jnp.float32).reshape(1, 4, 1, 1)
    std_b = jnp.asarray(std, jnp.float32).reshape(1, 4, 1, 1)

    module = Normalize(mean, std)

    # Path 1: float32 image.
    x_f32 = jax.random.normal(kf, (2, 4, 16, 16), dtype=jnp.float32)
    out_f32 = jax.block_until_ready(module({"image": x_f32})["image"])
    ref_f32 = (x_f32 - mean_b) / std_b
    # Kernel uses (x - m) * (1/s); allow ~1 ulp difference vs exact divide.
    assert out_f32.dtype == jnp.float32
    assert jnp.allclose(out_f32, ref_f32, atol=1e-6, rtol=1e-5), "f32 mismatch"

    # Path 2: uint8 image (cast fused inside the kernel).
    x_u8 = jax.random.randint(ki, (2, 4, 16, 16), 0, 256, dtype=jnp.int32).astype(jnp.uint8)
    out_u8 = jax.block_until_ready(module({"image": x_u8})["image"])
    ref_u8 = (x_u8.astype(jnp.float32) - mean_b) / std_b
    assert out_u8.dtype == jnp.float32
    assert jnp.allclose(out_u8, ref_u8, atol=1e-4, rtol=1e-5), "u8 mismatch"

    print("KERNEL_OK")
</pallas_src>

<mosaic_0001>
module attributes {stable_mosaic.version = 11 : i64} {
  func.func @_normalize_kernel(%arg0: i32, %arg1: i32, %arg2: memref<8x1xf32, #tpu.memory_space<vmem>>, %arg3: memref<8x1xf32, #tpu.memory_space<vmem>>, %arg4: memref<8x128xf32, #tpu.memory_space<vmem>>, %arg5: memref<8x128xf32, #tpu.memory_space<vmem>>) attributes {dimension_semantics = [#tpu.dimension_semantics<parallel>, #tpu.dimension_semantics<parallel>], iteration_bounds = array<i64: 1, 2>, scalar_prefetch = 0 : i64, scratch_operands = 0 : i64, tpu.core_type = #tpu.core_type<tc>, window_params = [{transform_indices = @transform_0, window_bounds = array<i64: 8, 1>}, {transform_indices = @transform_1, window_bounds = array<i64: 8, 1>}, {transform_indices = @transform_2, window_bounds = array<i64: 8, 128>}, {transform_indices = @transform_3, window_bounds = array<i64: 8, 128>}]} {
    %c0 = arith.constant 0 : index
    %c0_0 = arith.constant 0 : index
    %0 = vector.load %arg4[%c0, %c0_0] : memref<8x128xf32, #tpu.memory_space<vmem>>, vector<8x128xf32>
    %c0_1 = arith.constant 0 : index
    %c0_2 = arith.constant 0 : index
    %1 = vector.load %arg2[%c0_1, %c0_2] : memref<8x1xf32, #tpu.memory_space<vmem>>, vector<8x1xf32>
    %2 = vector.broadcast %1 : vector<8x1xf32> to vector<8x128xf32>
    %3 = arith.subf %0, %2 : vector<8x128xf32>
    %c0_3 = arith.constant 0 : index
    %c0_4 = arith.constant 0 : index
    %4 = vector.load %arg3[%c0_3, %c0_4] : memref<8x1xf32, #tpu.memory_space<vmem>>, vector<8x1xf32>
    %5 = vector.broadcast %4 : vector<8x1xf32> to vector<8x128xf32>
    %6 = arith.mulf %3, %5 : vector<8x128xf32>
    %c0_5 = arith.constant 0 : index
    %c0_6 = arith.constant 0 : index
    %7 = vector.load %arg5[%c0_5, %c0_6] : memref<8x128xf32, #tpu.memory_space<vmem>>, vector<8x128xf32>
    tpu.vector_store %arg5[%c0_5, %c0_6], %6 {strides = array<i32>} : memref<8x128xf32, #tpu.memory_space<vmem>>, vector<8x128xf32>,
    return
  }
  func.func @transform_0(%arg0: i32, %arg1: i32) -> (i32, i32) {
    %c0_i32 = arith.constant 0 : i32
    %c0_i32_0 = arith.constant 0 : i32
    return %arg0, %c0_i32 : i32, i32
  }
  func.func @transform_1(%arg0: i32, %arg1: i32) -> (i32, i32) {
    %c0_i32 = arith.constant 0 : i32
    %c0_i32_0 = arith.constant 0 : i32
    return %arg0, %c0_i32 : i32, i32
  }
  func.func @transform_2(%arg0: i32, %arg1: i32) -> (i32, i32) {
    %c0_i32 = arith.constant 0 : i32
    return %arg0, %arg1 : i32, i32
  }
  func.func @transform_3(%arg0: i32, %arg1: i32) -> (i32, i32) {
    %c0_i32 = arith.constant 0 : i32
    return %arg0, %arg1 : i32, i32
  }
}

</mosaic_0001>

<bundles_post_ra>
// kernel: tpu_custom_call.1
= control target key start
LH: loop header
LB: loop body
LE: loop exit
PB: predicated region body
PF: predicated region fallthrough
CT: control target
= control target key end

     0   :  { %8 = vsyncpa [#allocation3], 0  ;;  %s641_s0 = inlined_call_operand.vmem [shape: f32[8,1], index: 0, kind: input, shape index: {}]   ;;  %s642_s1 = inlined_call_operand.vmem [shape: f32[8,1], index: 1, kind: input, shape index: {}]   ;;  %s643_s2 = inlined_call_operand.vmem [shape: f32[8,256], index: 2, kind: input, shape index: {}]   ;;  %s644_s3 = inlined_call_operand.hbm [shape: f32[8,256], index: 3, kind: output, shape index: {}]  }
   0x1   :  { %10 = vsyncpa [#allocation3 + $0x1], 0  ;;  %s538_s12 = smov 0   ;;  %s540_s13 = smov 0  }
   0x2   :  { %s542_s14 = smov 0   ;;  %s544_s15 = smov 0  }
   0x3   :  { %s546_s16 = smov 0   ;;  %s548_s17 = smov 0  }
   0x4 LB: > { %s367_s18 = sadd.s32 4294967295, %s515_s17   ;;  %s368_s19 = sadd.s32 4294967294, %s515_s17   ;;  %s515_s17 = sphi %s548_s17, %s16_s17   ;;  %s511_s16 = sphi %s546_s16, %s651_s16   ;;  %s507_s15 = sphi %s544_s15, %s650_s15   ;;  %s503_s14 = sphi %s542_s14, %s649_s14   ;;  %s499_s13 = sphi %s540_s13, %s648_s13   ;;  %s495_s12 = sphi %s538_s12, %s647_s12  }
   0x5   : > { %s25_s20 = sadd.s32 1, %s511_s16  ;;  %s117_s21 = sadd.s32 1, %s503_s14 }
   0x6   : > { %p26_p0 = scmp.ge.s32.totalorder %s25_s20, 2  ;;  %p127_p1 = scmp.ne.s32.totalorder %s503_s14, %s499_s13 }
   0x7   : > { %p128_p2 = scmp.eq.s32.totalorder %s367_s18, 1  ;;  %p133_p3 = scmp.ne.s32.totalorder %s499_s13, %s495_s12 }
   0x8   : > { %s653_s20 = smov (%p26_p0, %s25_s20), 0  ;;  %p134_p5 = scmp.eq.s32.totalorder %s368_s19, 1 }
   0x9   : > { %p578_p4 = por %p128_p2, %p127_p1  ;;  %s113_s23 = ssub.s32 %s511_s16, %s653_s20 }
   0xa   : > { %p373_p6 = scmp.ge.s32.totalorder %s515_s17, 1  ;;  %p115_p7 = scmp.eq.s32.totalorder %s113_s23, 0 }
   0xb   : > { %p585_p8 = por %p134_p5, %p133_p3  ;;  %p177_p9 = scmp.lt.s32.totalorder %s515_s17, 3 }
   0xc   : > { %s591_s25 = scalar_select %p115_p7, %s503_s14, %s117_s21  }
   0xd   : > { %p178_p10 = pnand %p373_p6, %p177_p9 }
   0xe   : > { %p222_p11 = scmp.lt.s32.totalorder (!%p178_p10), %s507_s15, 1  ;;  %s209_s4 = sand.u32 (!%p178_p10), 1, %s499_s13  }
   0xf   : > { %181 = sbr.rel (%p178_p10) target bundleno = 150 (0x96), region = 32  ;;  %s374_s6 = sshll.u32 (!%p178_p10), %s209_s4, 3 }
  0x10   : > { %s377_s7 = sshll.u32 (!%p178_p10), %s507_s15, 3  ;;  %s211_s21 = scalar_lea.vmem (!%p178_p10), [#allocation2], %s374_s6 }
  0x11   : > { %s257_s19 = scalar_lea.hbm (!%p178_p10), %s644_s3, %s377_s7  ;;  %s259_s23 = sshll.u32 (!%p178_p10), %s211_s21, 4  ;;  %s260_s23 = int_to_ptr.vmem [resolvable:$true] %s259_s23 }
  0x12   : > { %s261_s26 = sshll.u32 (!%p178_p10), %s257_s19, 4  ;;  %s262_s26 = int_to_ptr.hbm [resolvable:$true] %s261_s26 }
  0x13   : > { %s451_s27 = sshra.s32 (!%p178_p10), %s262_s26, 4  ;;  %s452_s27 = int_to_ptr.hbm [resolvable:$true] %s451_s27 }
  0x14   : > { %v229_v0 = vld [vmem:[%s641_s0] sm:$0xff]  ;;  %v517_v1 = vmov 0   ;;  %s223_s30 = scalar_select %p222_p11, %s507_s15, 1 }
  0x15   : > { %436 = vset.pattern.permute.xlu0 %v517_v1  ;;  %v236_v2 = vld [vmem:[%s642_s1] sm:$0xff]  ;;  %s245_s15 = scalar_lea.sflag [#allocation3], %s209_s4  ;;  %s453_s28 = scalar_lea.hbm %s452_s27, 8 }
  0x16   : > { %232 = vperm.xlu0 %436, %v229_v0   ;;  %s375_s5 = sshll.u32 %s223_s30, 3  ;;  %p454_p12 = scmp.ne.s32.totalorder %s452_s27, %s453_s28 }
  0x17   : > { %s227_s10 = scalar_lea.vmem %s643_s2, %s375_s5  ;;  %s457_s5 = scalar_lea.hbm %s644_s3, 16 }
  0x18   : > { %v228_v4 = vld [vmem:[%s227_s10] sm:$0xff]  ;;  %p455_p13 = pnand %p454_p12, %p578_p4  ;;  %p458_p1 = scmp.lt.s32.totalorder %s452_s27, %s644_s3 }
  0x19   : > { %p459_p2 = scmp.lt.s32.totalorder %s457_s5, %s453_s28 }
  0x1a   : > { %p456_p0 = pneg %p455_p13 }
  0x1b   : > { %p460_p3 = por %p459_p2, %p458_p1 }
  0x1d   : > { %p461_p5 = pnand %p460_p3, %p456_p0 }
  0x1e   : > { %239 = vperm.xlu0 %436, %v236_v2  }
  0x88   : > { %v233_v3 = vpop.permute.xlu0 %232 }
  0x89   : > { %v235_v5 = vsub.f32 %v228_v4, %v233_v3 }
  0x90   : > { %v240_v6 = vpop.permute.xlu0 %239 }
  0x91   : > { %v242_v7 = vmul.f32 %v240_v6, %v235_v5 }
  0x93   : > { %243 = vst [vmem:[%s211_s21] sm:$0xff] %v242_v7 }
  0x94   : > { %464 = shalt.err (!%p461_p5)
}
  0x95   : > { %380 = dma.vmem_to_hbm [thread:$0]  (%p578_p4), %s260_s23, 128, %s262_s26, %s245_s15  }
  0x96 PF: > { %p386_p6 = scmp.ge.s32.totalorder %s515_s17, 2  ;;  %s273_s4 = sand.u32 1, %s495_s12  }
  0x97   : > { %s274_s8 = scalar_lea.sflag [#allocation3], %s273_s4 }
  0x98   : > { %p383_p7 = pnand %p386_p6, %p585_p8 }
  0x9a   : > { %p384_p9 = pneg %p383_p7 }
  0x9c   : > { %490 = dma.done.wait (%p384_p9), %s274_s8, 128  }
  0x9d   : > { %492 = vsyncadd (%p384_p9), %s274_s8, 4294967168  ;;  %s16_s17 = sadd.s32 1, %s515_s17   ;;  %s647_s12 = smov %s499_s13 }
  0x9e   : > { %p13_p10 = scmp.ge.s32.totalorder %s16_s17, 4   ;;  %s648_s13 = smov %s503_s14 }
  0x9f   : > { %s649_s14 = smov %s591_s25  ;;  %s650_s15 = smov %s511_s16 }
  0xa0   : > { %s651_s16 = smov %s653_s20  ;;  %15 = sbr.rel (!%p13_p10) target bundleno = 4 (0x4), region = 73 }
  0xa5   :  { %280 = vsyncpa [#allocation3], 1 }
  0xa6   :  { %282 = vsyncpa [#allocation3 + $0x1], 1 }

</bundles_post_ra>
